<compile_context>
chip_gen: v5e
topology: v5e:2x2
jax: 0.10.0
libtpu: 0.0.40
codegen_flags: <defaults>
</compile_context>

<pallas_src>
import math

import jax
import jax.numpy as jnp
from jax import lax
from jax.experimental import pallas as pl
from jax.experimental.pallas import tpu as pltpu

LN_EPS = 1e-5  # PyTorch nn.LayerNorm default


def _round_up(x, m):
    return (x + m - 1) // m * m


def _layernorm_affine(x_f32, g_ref, b_ref):
    """LayerNorm + affine over the last axis of an f32 (TS, D) tile.

    The tile always covers the true D (no lane padding), so no masking is
    needed.  Uses E[x^2] - mean^2 (two reductions, no extra elementwise pass).
    """
    inv_d = 1.0 / x_f32.shape[-1]
    mean = jnp.sum(x_f32, axis=-1, keepdims=True) * inv_d
    ex2 = jnp.sum(x_f32 * x_f32, axis=-1, keepdims=True) * inv_d
    var = jnp.maximum(ex2 - mean * mean, 0.0)
    x_hat = (x_f32 - mean) * lax.rsqrt(var + LN_EPS)
    return x_hat * g_ref[...].astype(jnp.float32) + b_ref[...].astype(jnp.float32)


# ----------------------------------------------------------------------------
# Kernel 1: standalone LayerNorm (generic PreNorm path, arbitrary fn).
# ----------------------------------------------------------------------------
def _layernorm_kernel(x_ref, g_ref, b_ref, o_ref):
    # x_ref: (TS, D); g_ref/b_ref: (1, D); o_ref: (TS, D)
    y = _layernorm_affine(x_ref[...].astype(jnp.float32), g_ref, b_ref)
    o_ref[...] = y.astype(o_ref.dtype)


def layernorm_pallas(x, gamma, beta, *, row_tile=None):
    """LayerNorm over the last axis of x (..., D) with affine params (D,)."""
    orig_shape = x.shape
    D = orig_shape[-1]
    rows = math.prod(orig_shape[:-1])
    x2 = x.reshape(rows, D)
    g2 = gamma.reshape(1, D)
    b2 = beta.reshape(1, D)

    xb = x.dtype.itemsize
    budget = 24 * 1024 * 1024  # double-buffered in + out must fit comfortably
    cap = row_tile if row_tile is not None else 1024
    cap = min(cap, max(8, (budget // (4 * D * xb)) // 8 * 8))
    # Full-extent block when the row count is small (always legal), otherwise
    # an 8-aligned tile; the ragged last tile is handled by the cdiv grid.
    ts = rows if rows <= cap else cap

    out = pl.pallas_call(
        _layernorm_kernel,
        out_shape=jax.ShapeDtypeStruct((rows, D), x.dtype),
        grid_spec=pltpu.PrefetchScalarGridSpec(
            num_scalar_prefetch=0,
            grid=(pl.cdiv(rows, ts),),
            in_specs=[
                pl.BlockSpec((ts, D), lambda i: (i, 0)),
                pl.BlockSpec((1, D), lambda i: (0, 0)),
                pl.BlockSpec((1, D), lambda i: (0, 0)),
            ],
            out_specs=pl.BlockSpec((ts, D), lambda i: (i, 0)),
        ),
        compiler_params=pltpu.CompilerParams(
            dimension_semantics=("parallel",),
            vmem_limit_bytes=48 * 1024 * 1024,
        ),
    )(x2, g2, b2)

    return out.reshape(orig_shape)


# ----------------------------------------------------------------------------
# Kernel 2: fused PreNorm + Linear (LayerNorm + D->E projection, one kernel).
# ----------------------------------------------------------------------------
def _prenorm_linear_kernel(x_ref, w_ref, g_ref, b_ref, o_ref, y_ref):
    # x_ref: (TS, D); w_ref: (D, TN); g/b: (1, D); o_ref: (TS, TN); y_ref: (TS, D)
    @pl.when(pl.program_id(1) == 0)
    def _():
        # LayerNorm + affine + cast to the weight dtype, once per row tile.
        y = _layernorm_affine(x_ref[...].astype(jnp.float32), g_ref, b_ref)
        y_ref[...] = y.astype(y_ref.dtype)

    # Native-dtype single-pass MXU matmul with f32 accumulation.
    o_ref[...] = jnp.dot(
        y_ref[...], w_ref[...], preferred_element_type=jnp.float32
    ).astype(o_ref.dtype)


def pre_norm_linear_pallas(x, gamma, beta, w, *, row_tile=None, n_tile=None):
    """Fused fn(LayerNorm(x)) where fn(z) = z @ w.  x: (..., D), w: (D, E)."""
    orig_shape = x.shape
    D = orig_shape[-1]
    E = w.shape[-1]
    rows = math.prod(orig_shape[:-1])
    x2 = x.reshape(rows, D)
    g2 = gamma.reshape(1, D)
    b2 = beta.reshape(1, D)

    out_dtype = jnp.promote_types(x.dtype, w.dtype)
    xb = x.dtype.itemsize
    wb = w.dtype.itemsize
    ob = jnp.dtype(out_dtype).itemsize

    row_cap = row_tile if row_tile is not None else 512
    n_cap = n_tile if n_tile is not None else 512

    ts = rows if rows <= row_cap else (row_cap // 8) * 8
    if E <= n_cap:
        tn = E  # full-extent N block, no alignment constraint
    else:
        e128 = _round_up(E, 128)
        tn = 128
        for cand in range((n_cap // 128) * 128, 127, -128):
            if e128 % cand == 0:
                tn = cand
                break

    def vmem_est(ts_, tn_):
        # double-buffered x / w / out pipeline buffers + y scratch + gamma/beta
        return (2 * (ts_ * D * xb + D * tn_ * wb + ts_ * tn_ * ob)
                + ts_ * D * wb + 4 * D * xb)

    budget = 28 * 1024 * 1024  # leave headroom under the 48 MiB limit (v7x: 64 MiB physical)
    while vmem_est(ts, tn) > budget:
        if ts >= 256:
            ts = (ts // 2) // 8 * 8
        elif tn >= 256:
            tn = (tn // 2) // 128 * 128
        else:
            break

    out = pl.pallas_call(
        _prenorm_linear_kernel,
        out_shape=jax.ShapeDtypeStruct((rows, E), out_dtype),
        grid_spec=pltpu.PrefetchScalarGridSpec(
            num_scalar_prefetch=0,
            grid=(pl.cdiv(rows, ts), pl.cdiv(E, tn)),
            in_specs=[
                pl.BlockSpec((ts, D), lambda i, j: (i, 0)),
                pl.BlockSpec((D, tn), lambda i, j: (0, j)),
                pl.BlockSpec((1, D), lambda i, j: (0, 0)),
                pl.BlockSpec((1, D), lambda i, j: (0, 0)),
            ],
            out_specs=pl.BlockSpec((ts, tn), lambda i, j: (i, j)),
            scratch_shapes=[pltpu.VMEM((ts, D), w.dtype)],
        ),
        compiler_params=pltpu.CompilerParams(
            # Row axis is megacore-parallel; N axis must stay sequential since
            # the normalized activation is carried in VMEM scratch across j.
            dimension_semantics=("parallel", "arbitrary"),
            vmem_limit_bytes=48 * 1024 * 1024,
        ),
    )(x2, w, g2, b2)

    return out.reshape(orig_shape[:-1] + (E,))


def pre_norm(x, gamma, beta, fn, **kwargs):
    """Generic PreNorm.forward: fn(LayerNorm(x), **kwargs).

    # TODO(synk): `fn` is an arbitrary wrapped sub-module (Attention /
    # FeedForward in ViViT) applied as a plain JAX callable; when `fn` starts
    # with a Linear, prefer `pre_norm_linear_pallas` (fused, no HBM round trip
    # of the normalized activation).
    """
    return fn(layernorm_pallas(x, gamma, beta), **kwargs)


# ----------------------------------------------------------------------------
# Demo / correctness checks.
# ----------------------------------------------------------------------------
def _layernorm_ref(x, gamma, beta):
    mean = jnp.mean(x, axis=-1, keepdims=True)
    var = jnp.mean((x - mean) ** 2, axis=-1, keepdims=True)
    return (x - mean) / jnp.sqrt(var + LN_EPS) * gamma + beta


def _run_case(case_id, B, S, D, E, fused_atol, ln_row_tile=None, **tile_kwargs):
    key = jax.random.fold_in(jax.random.PRNGKey(0), case_id)
    kx, kw, kg, kb = jax.random.split(key, 4)
    x = jax.random.normal(kx, (B, S, D), dtype=jnp.float32)
    gamma = 1.0 + 0.1 * jax.random.normal(kg, (D,), dtype=jnp.float32)
    beta = 0.1 * jax.random.normal(kb, (D,), dtype=jnp.float32)
    w = jax.random.normal(kw, (D, E), dtype=jnp.float32) * 0.05

    # Pure-JAX reference (PyTorch LayerNorm semantics; high-precision matmul).
    ref_ln = _layernorm_ref(x, gamma, beta)
    ref_out = jnp.einsum("bsd,de->bse", ref_ln, w, precision=lax.Precision.HIGHEST)

    # Standalone Pallas LayerNorm.
    ln_out = layernorm_pallas(x, gamma, beta, row_tile=ln_row_tile)
    jax.block_until_ready(ln_out)
    assert ln_out.shape == x.shape
    assert jnp.allclose(ln_out, ref_ln, atol=1e-4, rtol=1e-4), f"LN mismatch (case {case_id})"

    # Fused PreNorm + Linear (native-dtype MXU matmul => looser tolerance).
    fused = pre_norm_linear_pallas(x, gamma, beta, w, **tile_kwargs)
    jax.block_until_ready(fused)
    assert fused.shape == (B, S, E)
    assert jnp.allclose(fused, ref_out, atol=fused_atol, rtol=fused_atol), \
        f"fused mismatch (case {case_id}): {jnp.max(jnp.abs(fused - ref_out))}"

    # Generic PreNorm path: Pallas LayerNorm + arbitrary JAX fn.
    fn = lambda y: jnp.einsum("bsd,de->bse", y, w, precision=lax.Precision.HIGHEST)
    out_generic = pre_norm(x, gamma, beta, fn)
    jax.block_until_ready(out_generic)
    assert out_generic.shape == (B, S, E)
    assert jnp.allclose(out_generic, ref_out, atol=1e-3, rtol=1e-3), \
        f"generic mismatch (case {case_id})"


if __name__ == "__main__":
    # 1) Spec-scale shapes (B=2, S=8, dim=32), aligned rows.
    _run_case(1, B=2, S=8, D=32, E=32, fused_atol=2e-2)
    # 2) Odd shapes: full-dim blocks everywhere, no padding anywhere.
    _run_case(2, B=3, S=5, D=48, E=80, fused_atol=2e-2)
    # 3) Multi-tile grid: ragged row tail (272 rows, tile 128) and several
    #    N tiles sharing the scratch-carried LayerNorm result.
    _run_case(3, B=2, S=136, D=128, E=384, fused_atol=3e-2,
              ln_row_tile=64, row_tile=128, n_tile=128)

    print("KERNEL_OK")
</pallas_src>

<mosaic_0001>
module attributes {stable_mosaic.version = 11 : i64} {
  func.func @_layernorm_kernel(%arg0: i32, %arg1: memref<16x32xf32, #tpu.memory_space<vmem>>, %arg2: memref<1x32xf32, #tpu.memory_space<vmem>>, %arg3: memref<1x32xf32, #tpu.memory_space<vmem>>, %arg4: memref<16x32xf32, #tpu.memory_space<vmem>>) attributes {dimension_semantics = [#tpu.dimension_semantics<parallel>], iteration_bounds = array<i64: 1>, scalar_prefetch = 0 : i64, scratch_operands = 0 : i64, tpu.core_type = #tpu.core_type<tc>, window_params = [{transform_indices = @transform_0, window_bounds = array<i64: 16, 32>}, {pipeline_mode = #tpu.pipeline_mode<synchronous>, transform_indices = @transform_1, window_bounds = array<i64: 1, 32>}, {pipeline_mode = #tpu.pipeline_mode<synchronous>, transform_indices = @transform_2, window_bounds = array<i64: 1, 32>}, {transform_indices = @transform_3, window_bounds = array<i64: 16, 32>}]} {
    %c0 = arith.constant 0 : index
    %c0_0 = arith.constant 0 : index
    %0 = vector.load %arg1[%c0, %c0_0] : memref<16x32xf32, #tpu.memory_space<vmem>>, vector<16x32xf32>
    %cst = arith.constant dense<0.000000e+00> : vector<16xf32>
    %1 = vector.multi_reduction <add>, %0, %cst [1] : vector<16x32xf32> to vector<16xf32>
    %2 = vector.shape_cast %1 : vector<16xf32> to vector<16x1xf32>
    %cst_1 = arith.constant 3.125000e-02 : f32
    %3 = vector.broadcast %cst_1 : f32 to vector<16x1xf32>
    %4 = arith.mulf %2, %3 : vector<16x1xf32>
    %5 = arith.mulf %0, %0 : vector<16x32xf32>
    %cst_2 = arith.constant dense<0.000000e+00> : vector<16xf32>
    %6 = vector.multi_reduction <add>, %5, %cst_2 [1] : vector<16x32xf32> to vector<16xf32>
    %7 = vector.shape_cast %6 : vector<16xf32> to vector<16x1xf32>
    %cst_3 = arith.constant 3.125000e-02 : f32
    %8 = vector.broadcast %cst_3 : f32 to vector<16x1xf32>
    %9 = arith.mulf %7, %8 : vector<16x1xf32>
    %10 = arith.mulf %4, %4 : vector<16x1xf32>
    %11 = arith.subf %9, %10 : vector<16x1xf32>
    %cst_4 = arith.constant 0.000000e+00 : f32
    %12 = vector.broadcast %cst_4 : f32 to vector<16x1xf32>
    %13 = arith.maximumf %11, %12 : vector<16x1xf32>
    %14 = vector.broadcast %4 : vector<16x1xf32> to vector<16x32xf32>
    %15 = arith.subf %0, %14 : vector<16x32xf32>
    %cst_5 = arith.constant 9.99999974E-6 : f32
    %16 = vector.broadcast %cst_5 : f32 to vector<16x1xf32>
    %17 = arith.addf %13, %16 : vector<16x1xf32>
    %18 = math.rsqrt %17 : vector<16x1xf32>
    %19 = vector.broadcast %18 : vector<16x1xf32> to vector<16x32xf32>
    %20 = arith.mulf %15, %19 : vector<16x32xf32>
    %c0_6 = arith.constant 0 : index
    %c0_7 = arith.constant 0 : index
    %21 = vector.load %arg2[%c0_6, %c0_7] : memref<1x32xf32, #tpu.memory_space<vmem>>, vector<1x32xf32>
    %22 = vector.broadcast %21 : vector<1x32xf32> to vector<16x32xf32>
    %23 = arith.mulf %20, %22 : vector<16x32xf32>
    %c0_8 = arith.constant 0 : index
    %c0_9 = arith.constant 0 : index
    %24 = vector.load %arg3[%c0_8, %c0_9] : memref<1x32xf32, #tpu.memory_space<vmem>>, vector<1x32xf32>
    %25 = vector.broadcast %24 : vector<1x32xf32> to vector<16x32xf32>
    %26 = arith.addf %23, %25 : vector<16x32xf32>
    %c0_10 = arith.constant 0 : index
    %c0_11 = arith.constant 0 : index
    %27 = vector.load %arg4[%c0_10, %c0_11] : memref<16x32xf32, #tpu.memory_space<vmem>>, vector<16x32xf32>
    tpu.vector_store %arg4[%c0_10, %c0_11], %26 {strides = array<i32>} : memref<16x32xf32, #tpu.memory_space<vmem>>, vector<16x32xf32>,
    return
  }
  func.func @transform_0(%arg0: i32) -> (i32, i32) {
    %c0_i32 = arith.constant 0 : i32
    %c0_i32_0 = arith.constant 0 : i32
    return %arg0, %c0_i32 : i32, i32
  }
  func.func @transform_1(%arg0: i32) -> (i32, i32) {
    %c0_i32 = arith.constant 0 : i32
    %c0_i32_0 = arith.constant 0 : i32
    %c0_i32_1 = arith.constant 0 : i32
    return %c0_i32, %c0_i32_0 : i32, i32
  }
  func.func @transform_2(%arg0: i32) -> (i32, i32) {
    %c0_i32 = arith.constant 0 : i32
    %c0_i32_0 = arith.constant 0 : i32
    %c0_i32_1 = arith.constant 0 : i32
    return %c0_i32, %c0_i32_0 : i32, i32
  }
  func.func @transform_3(%arg0: i32) -> (i32, i32) {
    %c0_i32 = arith.constant 0 : i32
    %c0_i32_0 = arith.constant 0 : i32
    return %arg0, %c0_i32 : i32, i32
  }
}

</mosaic_0001>

<bundles_post_ra>
// kernel: tpu_custom_call.1
= control target key start
LH: loop header
LB: loop body
LE: loop exit
PB: predicated region body
PF: predicated region fallthrough
CT: control target
= control target key end

     0   :  { %8 = vsyncpa [#allocation3], 0  ;;  %s270_s0 = inlined_call_operand.hbm [shape: f32[16,32], index: 0, kind: input, shape index: {}]   ;;  %s271_s1 = inlined_call_operand.hbm [shape: f32[1,32], index: 1, kind: input, shape index: {}]   ;;  %s272_s2 = inlined_call_operand.vmem [shape: f32[1,32], index: 2, kind: input, shape index: {}]   ;;  %s273_s3 = inlined_call_operand.hbm [shape: f32[16,32], index: 3, kind: output, shape index: {}]  }
   0x1   :  { %9 = vsyncpa [#allocation6], 0 }
   0x2   :  { %10 = vsyncpa [#allocation4], 0  ;;  %s15_s14 = sshll.u32 %s270_s0, 4  ;;  %s221_s15 = smov [#allocation2]   ;;  %s16_s14 = int_to_ptr.hbm [resolvable:$true] %s15_s14 }
   0x3   :  { %s17_s16 = sshll.u32 %s221_s15, 4  ;;  %s29_s19 = sshll.u32 %s271_s1, 4  ;;  %s18_s16 = int_to_ptr.vmem [resolvable:$true] %s17_s16  ;;  %s30_s19 = int_to_ptr.hbm [resolvable:$true] %s29_s19 }
   0x4   :  { %s222_s20 = smov 128   ;;  %s223_s21 = smov 8  }
   0x5   :  { %23 = dma.hbm_to_vmem [thread:$0]  %s16_s14, 256, %s18_s16, [#allocation3], %s222_s20, %s222_s20, %s223_s21  }
   0x6   :  { %s224_s22 = smov [#allocation5]  }
   0x7   :  { %s31_s23 = sshll.u32 %s224_s22, 4  ;;  %s32_s23 = int_to_ptr.vmem [resolvable:$true] %s31_s23 }
   0x8   :  { %34 = dma.hbm_to_vmem [thread:$0]  %s30_s19, 16, %s32_s23, [#allocation6]  }
   0x9   :  { %215 = dma.done.wait [#allocation3], 256  }
   0xa   :  { %216 = vsyncadd [#allocation3], 4294967040 }
   0xb   :  { %217 = dma.done.wait [#allocation6], 16  }
   0xc   :  { %218 = vsyncadd [#allocation6], 4294967280  ;;  %vm47_vm0 = vcmask 261120   ;;  %v45_v0 = vld [vmem:[#allocation2] sm:$0xff]  ;;  %v46_v3 = vld [vmem:[#allocation2 + $0x8] sm:$0xff]  ;;  %s225_s24 = smov [#allocation7]  }
   0xd   :  { %v48_v1 = vsel %vm47_vm0, %v45_v0, 0.0  ;;  %v56_v2 = vmul.f32 %v45_v0, %v45_v0  ;;  %v57_v5 = vmul.f32 %v46_v3, %v46_v3  ;;  %v51_v6 = vsel %vm47_vm0, %v46_v3, 0.0  ;;  %v137_v33 = vld [vmem:[#allocation5] ss:$0 sm:$0xff]  ;;  %v138_v37 = vld [vmem:[%s272_s2] ss:$0 sm:$0xff] }
   0xe   :  { %49 = vadd.xlane.f32.xlu0 %v48_v1  ;;  %s116_s25 = sshll.u32 %s225_s24, 4  ;;  %s118_s28 = sshll.u32 %s273_s3, 4  ;;  %s117_s25 = int_to_ptr.vmem [resolvable:$true] %s116_s25  ;;  %s119_s28 = int_to_ptr.hbm [resolvable:$true] %s118_s28 }
   0xf   :  { %v58_v4 = vsel %vm47_vm0, %v56_v2, 0.0  ;;  %v61_v7 = vsel %vm47_vm0, %v57_v5, 0.0 }
  0x10   :  { %59 = vadd.xlane.f32.xlu1 %v58_v4 }
  0x16   :  { %52 = vadd.xlane.f32.xlu0 %v51_v6 }
  0x18   :  { %62 = vadd.xlane.f32.xlu1 %v61_v7 }
  0x81   :  { %v50_v8 = vpop.xlane.xlu0 %49 }
  0x82   :  { %v54_v9 = vmul.f32 0.03125, %v50_v8 }
  0x83   :  { %v60_v10 = vpop.xlane.xlu1 %59 }
  0x84   :  { %v66_v11 = vmul.f32 %v54_v9, %v54_v9  ;;  %v64_v12 = vmul.f32 0.03125, %v60_v10  ;;  %v72_v31 = vsub.f32 %v45_v0, %v54_v9 }
  0x86   :  { %v68_v13 = vsub.f32 %v64_v12, %v66_v11 }
  0x88   :  { %v70_v14 = vmax.f32 %v68_v13, 0.0 }
  0x89   :  { %v53_v15 = vpop.xlane.xlu0 %52 }
  0x8a   :  { %v74_v16 = vadd.f32 1e-05, %v70_v14  ;;  %v55_v17 = vmul.f32 0.03125, %v53_v15 }
  0x8b   :  { %v63_v18 = vpop.xlane.xlu1 %62 }
  0x8c   :  { %139 = vrsqrt.f32 %v74_v16  ;;  %v67_v19 = vmul.f32 %v55_v17, %v55_v17  ;;  %v65_v20 = vmul.f32 0.03125, %v63_v18  ;;  %vm82_vm2 = vweird.f32 %v74_v16 }
  0x8d   :  { %v73_v43 = vsub.f32 %v46_v3, %v55_v17 }
  0x8e   :  { %v69_v21 = vsub.f32 %v65_v20, %v67_v19 }
  0x90   :  { %v71_v22 = vmax.f32 %v69_v21, 0.0 }
  0x92   :  { %v140_v23 = vpop.eup %139  ;;  %v75_v25 = vadd.f32 1e-05, %v71_v22 }
  0x93   :  { %v77_v24 = vmul.f32 %v140_v23, %v74_v16  ;;  %vm83_vm1 = vweird.f32 %v140_v23 }
  0x94   :  { %141 = vrsqrt.f32 %v75_v25  ;;  %vm84_vm3 = vmor %vm82_vm2, %vm83_vm1  ;;  %vm92_vm5 = vweird.f32 %v75_v25 }
  0x95   :  { %v78_v26 = vmul.f32 %v140_v23, %v77_v24 }
  0x97   :  { %v79_v27 = vmul.f32 0.5, %v78_v26 }
  0x99   :  { %v80_v28 = vsub.f32 1.5, %v79_v27 }
  0x9a   :  { %v142_v29 = vpop.eup %141 }
  0x9b   :  { %v81_v30 = vmul.f32 %v140_v23, %v80_v28  ;;  %v87_v32 = vmul.f32 %v142_v29, %v75_v25  ;;  %vm93_vm4 = vweird.f32 %v142_v29 }
  0x9c   :  { %vm94_vm6 = vmor %vm92_vm5, %vm93_vm4 }
  0x9d   :  { %v85_v34 = vsel %vm84_vm3, %v140_v23, %v81_v30  ;;  %v88_v36 = vmul.f32 %v142_v29, %v87_v32 }
  0x9e   :  { %v96_v35 = vmul.f32 %v85_v34, %v72_v31 }
  0x9f   :  { %v89_v38 = vmul.f32 0.5, %v88_v36 }
  0xa0   :  { %v102_v39 = vmul.f32 %v137_v33, %v96_v35 }
  0xa1   :  { %v90_v40 = vsub.f32 1.5, %v89_v38 }
  0xa2   :  { %v108_v41 = vadd.f32 %v138_v37, %v102_v39 }
  0xa3   :  { %v91_v42 = vmul.f32 %v142_v29, %v90_v40 }
  0xa4   :  { %110 = vst.msk [vmem:[#allocation7] sm:$0xff] %vm47_vm0, %v108_v41 }
  0xa5   :  { %v95_v44 = vsel %vm94_vm6, %v142_v29, %v91_v42 }
  0xa6   :  { %v97_v45 = vmul.f32 %v95_v44, %v73_v43 }
  0xa8   :  { %v103_v46 = vmul.f32 %v137_v33, %v97_v45 }
  0xaa   :  { %v109_v47 = vadd.f32 %v138_v37, %v103_v46 }
  0xac   :  { %111 = vst.msk [vmem:[#allocation7 + $0x8] sm:$0xff] %vm47_vm0, %v109_v47 }
  0xad   :  { %124 = dma.vmem_to_hbm [thread:$0]  %s117_s25, 256, %s119_s28, [#allocation4], %s222_s20, %s222_s20, %s223_s21  }
  0xae   :  { %219 = dma.done.wait [#allocation4], 256  }
  0xaf   :  { %220 = vsyncadd [#allocation4], 4294967040 }
  0xb0   :  { %129 = vsyncpa [#allocation3], 1 }
  0xb1   :  { %130 = vsyncpa [#allocation6], 1 }
  0xb2   :  { %131 = vsyncpa [#allocation4], 1 }

</bundles_post_ra>
